<compile_context>
chip_gen: v5e
topology: v5e:2x2
jax: 0.10.0
libtpu: 0.0.40
codegen_flags: <defaults>
</compile_context>

<pallas_src>
import functools

import jax
import jax.numpy as jnp
from jax.experimental import pallas as pl
from jax.experimental.pallas import tpu as pltpu


def _round_up(x, m):
    return ((x + m - 1) // m) * m


def _generator_kernel(noise_ref, labels_ref, w1n_ref, lproj_ref, w2_ref,
                      gamma_ref, beta_ref, w3_ref, b3_ref, o_ref,
                      sum_ref, sqsum_ref, *, batch_real, tm, nlpad):
    phase = pl.program_id(0)          # 0: BN batch-stats sweep, 1: normalize+emit
    i = pl.program_id(1)              # batch tile index

    # --- block 1: Linear(latent+num_labels -> 256) + LeakyReLU(0.2), no norm ---
    # Embedding gather + concat folded into:
    #   noise @ W1[:latent]  +  onehot(labels) @ (E @ W1[latent:] + b1)
    # with the tiny label table resident in VMEM (one-hot matmul on the MXU).
    onehot = (labels_ref[...] ==
              jax.lax.broadcasted_iota(jnp.int32, (tm, nlpad), 1)
              ).astype(jnp.bfloat16)
    h1 = jnp.dot(noise_ref[...].astype(jnp.bfloat16), w1n_ref[...],
                 preferred_element_type=jnp.float32)
    h1 = h1 + jnp.dot(onehot, lproj_ref[...], preferred_element_type=jnp.float32)
    h1 = jnp.maximum(h1, 0.2 * h1)                          # LeakyReLU(0.2)

    # --- block 2 pre-norm: Linear(256 -> 256). b2 dropped: an additive bias
    # before training-mode BatchNorm is cancelled by the batch-mean subtraction.
    h2 = jnp.dot(h1.astype(jnp.bfloat16), w2_ref[...],
                 preferred_element_type=jnp.float32)

    @pl.when((phase == 0) & (i == 0))
    def _init_stats():
        sum_ref[...] = jnp.zeros_like(sum_ref)
        sqsum_ref[...] = jnp.zeros_like(sqsum_ref)

    @pl.when(phase == 0)
    def _accumulate_stats():
        # Mask batch-padding rows so they don't pollute the BN statistics.
        row = i * tm + jax.lax.broadcasted_iota(jnp.int32, (tm, 1), 0)
        hm = h2 * (row < batch_real).astype(jnp.float32)
        sum_ref[...] = sum_ref[...] + jnp.sum(hm, axis=0, keepdims=True)
        sqsum_ref[...] = sqsum_ref[...] + jnp.sum(hm * hm, axis=0, keepdims=True)

    @pl.when(phase == 1)
    def _normalize_and_emit():
        # Training-mode BatchNorm1d from accumulated batch statistics.
        inv_b = 1.0 / batch_real
        mean = sum_ref[...] * inv_b
        var = jnp.maximum(sqsum_ref[...] * inv_b - mean * mean, 0.0)
        scale = gamma_ref[...] * jax.lax.rsqrt(var + 1e-5)   # folded BN affine
        shift = beta_ref[...] - mean * scale
        h2n = h2 * scale + shift
        h2n = jnp.maximum(h2n, 0.2 * h2n)                    # LeakyReLU(0.2)

        # --- output: Linear(256 -> nf_pad) + Sigmoid.  w3/b3 were pre-scaled by
        # 0.5, so sigmoid(x) = 0.5*tanh(0.5*x) + 0.5 becomes tanh(h3)*0.5 + 0.5.
        h3 = jnp.dot(h2n.astype(jnp.bfloat16), w3_ref[...],
                     preferred_element_type=jnp.float32) + b3_ref[...]
        # TODO(synk): emit bf16 if the consumer tolerates it (halves writeback).
        o_ref[...] = jnp.tanh(h3) * 0.5 + 0.5


def prepare_params(params, *, latent_dim):
    """One-time parameter preprocessing, hoisted out of the per-call path."""
    num_labels = params["embedding"].shape[0]
    num_features = params["w3"].shape[1]

    # Fold embedding gather + concat into a per-label row-bias table:
    #   concat(noise, E[labels]) @ W1 + b1
    #     == noise @ W1[:latent] + (E @ W1[latent:] + b1)[labels]
    w1_noise = params["w1"][:latent_dim]
    label_proj = params["embedding"] @ params["w1"][latent_dim:] + params["b1"]
    nlpad = _round_up(max(num_labels, 8), 8)
    label_proj = jnp.pad(label_proj, ((0, nlpad - num_labels), (0, 0)))

    # Lane-dense output: pad the final Linear to a multiple of 128 lanes and
    # fold the 0.5 of the tanh-based sigmoid into the weights/bias.
    nf_pad = _round_up(max(num_features, 128), 128)
    w3 = jnp.pad(params["w3"], ((0, 0), (0, nf_pad - num_features))) * 0.5
    b3 = jnp.pad(params["b3"], ((0, 0), (0, nf_pad - num_features))) * 0.5

    # NOTE: b2 intentionally dropped (cancelled by training-mode BatchNorm).
    return dict(
        w1n=w1_noise.astype(jnp.bfloat16),        # (latent, 256)       bf16
        lproj=label_proj.astype(jnp.bfloat16),    # (nlpad, 256)        bf16
        w2=params["w2"].astype(jnp.bfloat16),     # (256, 256)          bf16
        gamma=params["gamma"].astype(jnp.float32),
        beta=params["beta"].astype(jnp.float32),
        w3=w3.astype(jnp.bfloat16),               # (256, nf_pad) * 0.5 bf16
        b3=b3.astype(jnp.float32),                # (1, nf_pad)   * 0.5 f32
    )


@functools.partial(jax.jit, static_argnames=("num_features",))
def generator_forward(noise, labels, prep, *, num_features):
    """noise: (B, latent) f32, labels: (B,) int32 -> (B, num_features) f32."""
    batch, latent_dim = noise.shape
    hidden = prep["w2"].shape[0]
    nlpad = prep["lproj"].shape[0]
    nf_pad = prep["w3"].shape[1]

    # Batch tiling: rows a multiple of 16 (bf16 sublane packing); tile <= 512
    # rows keeps double-buffered tiles far under v7x's 64 MiB VMEM.
    bpad = _round_up(batch, 16)
    tm = min(bpad, 512)
    bpad = _round_up(bpad, tm)
    n_tiles = bpad // tm

    noise_p = noise.astype(jnp.float32)           # cast to bf16 inside the kernel
    labels_p = labels.astype(jnp.int32).reshape(batch, 1)
    if bpad != batch:
        noise_p = jnp.pad(noise_p, ((0, bpad - batch), (0, 0)))
        labels_p = jnp.pad(labels_p, ((0, bpad - batch), (0, 0)))

    resident = lambda p, i: (0, 0)                # weights stay resident in VMEM
    stream = lambda p, i: (i, 0)                  # batch tiles stream both phases

    flops = 2 * bpad * (2 * (latent_dim + nlpad + hidden) * hidden
                        + hidden * nf_pad)
    bytes_accessed = (
        2 * (noise_p.size * 4 + labels_p.size * 4)
        + (prep["w1n"].size + prep["lproj"].size + prep["w2"].size
           + prep["w3"].size) * 2
        + (prep["gamma"].size + prep["beta"].size + prep["b3"].size) * 4
        + bpad * nf_pad * 4)

    out = pl.pallas_call(
        functools.partial(_generator_kernel,
                          batch_real=batch, tm=tm, nlpad=nlpad),
        out_shape=jax.ShapeDtypeStruct((bpad, nf_pad), jnp.float32),
        grid_spec=pltpu.PrefetchScalarGridSpec(
            num_scalar_prefetch=0,
            grid=(2, n_tiles),                    # (stats sweep, emit sweep)
            in_specs=[
                pl.BlockSpec((tm, latent_dim), stream),      # noise       f32
                pl.BlockSpec((tm, 1), stream),               # labels      i32
                pl.BlockSpec((latent_dim, hidden), resident),  # W1[:lat]  bf16
                pl.BlockSpec((nlpad, hidden), resident),       # label_proj bf16
                pl.BlockSpec((hidden, hidden), resident),      # W2        bf16
                pl.BlockSpec((1, hidden), resident),           # gamma     f32
                pl.BlockSpec((1, hidden), resident),           # beta      f32
                pl.BlockSpec((hidden, nf_pad), resident),      # 0.5*W3    bf16
                pl.BlockSpec((1, nf_pad), resident),           # 0.5*b3    f32
            ],
            # Phase 0 never writes the output; pin it to block 0 so the stats
            # sweep produces no garbage writeback traffic.
            out_specs=pl.BlockSpec((tm, nf_pad), lambda p, i: (i * p, 0)),
            scratch_shapes=[pltpu.VMEM((1, hidden), jnp.float32),   # sum
                            pltpu.VMEM((1, hidden), jnp.float32)],  # sum of sq
        ),
        compiler_params=pltpu.CompilerParams(
            # Phase axis must be sequential; the batch axis shares the BN-stats
            # scratch accumulator, so it is sequential too (see TODO above for
            # the megacore-parallel variant).
            dimension_semantics=("arbitrary", "arbitrary"),
            vmem_limit_bytes=32 * 1024 * 1024,
        ),
        cost_estimate=pl.CostEstimate(
            flops=flops,
            transcendentals=bpad * nf_pad + n_tiles * hidden,   # tanh + rsqrt
            bytes_accessed=bytes_accessed),
    )(noise_p, labels_p, prep["w1n"], prep["lproj"], prep["w2"],
      prep["gamma"], prep["beta"], prep["w3"], prep["b3"])
    return out[:batch, :num_features]


def init_params(key, num_features, num_labels, latent_dim):
    """Deterministic synthetic parameters (PyTorch-default-ish uniform init)."""
    ks = jax.random.split(key, 8)
    in_dim = latent_dim + num_labels

    def lin(kw, kb, fan_in, fan_out):
        bound = 1.0 / jnp.sqrt(fan_in)
        w = jax.random.uniform(kw, (fan_in, fan_out), jnp.float32, -bound, bound)
        b = jax.random.uniform(kb, (1, fan_out), jnp.float32, -bound, bound)
        return w, b

    w1, b1 = lin(ks[0], ks[1], in_dim, 256)
    w2, b2 = lin(ks[2], ks[3], 256, 256)
    w3, b3 = lin(ks[4], ks[5], 256, num_features)
    embedding = jax.random.normal(ks[6], (num_labels, num_labels), jnp.float32)
    gamma = jnp.ones((1, 256), jnp.float32)   # BatchNorm1d affine weight
    beta = jnp.zeros((1, 256), jnp.float32)   # BatchNorm1d affine bias
    return dict(embedding=embedding, w1=w1, b1=b1, w2=w2, b2=b2,
                gamma=gamma, beta=beta, w3=w3, b3=b3)


def _reference_forward(noise, labels, params):
    """Pure-JAX f32 reference mirroring the PyTorch module (training mode)."""
    emb = jnp.take(params["embedding"], labels, axis=0)
    x = jnp.concatenate([noise, emb], axis=-1)
    h1 = x @ params["w1"] + params["b1"]
    h1 = jnp.where(h1 > 0, h1, 0.2 * h1)
    h2 = h1 @ params["w2"] + params["b2"]
    mean = jnp.mean(h2, axis=0, keepdims=True)
    var = jnp.mean((h2 - mean) ** 2, axis=0, keepdims=True)
    h2 = (h2 - mean) * jax.lax.rsqrt(var + 1e-5) * params["gamma"] + params["beta"]
    h2 = jnp.where(h2 > 0, h2, 0.2 * h2)
    h3 = h2 @ params["w3"] + params["b3"]
    return jax.nn.sigmoid(h3)


if __name__ == "__main__":
    # Small, module-consistent shapes.
    num_features = 64
    num_labels = 4
    latent_dim = 32
    batch = 8

    key = jax.random.PRNGKey(0)
    k_params, k_noise, k_labels = jax.random.split(key, 3)

    params = init_params(k_params, num_features, num_labels, latent_dim)
    prep = prepare_params(params, latent_dim=latent_dim)   # one-time, hoisted

    noise = jax.random.normal(k_noise, (batch, latent_dim), jnp.float32)
    labels = jax.random.randint(k_labels, (batch,), 0, num_labels, jnp.int32)

    out = generator_forward(noise, labels, prep, num_features=num_features)
    out = jax.block_until_ready(out)

    assert out.shape == (batch, num_features)
    assert bool(jnp.all((out >= 0.0) & (out <= 1.0)))      # sigmoid range sanity

    ref = _reference_forward(noise, labels, params)        # f32 reference
    assert bool(jnp.max(jnp.abs(out - ref)) < 5e-2)        # bf16-matmul tolerance

    print("KERNEL_OK")
</pallas_src>

<mosaic_0001>
module attributes {stable_mosaic.version = 11 : i64} {
  func.func @_generator_kernel(%arg0: i32, %arg1: i32, %arg2: memref<16x32xf32, #tpu.memory_space<vmem>>, %arg3: memref<16x1xi32, #tpu.memory_space<vmem>>, %arg4: memref<32x256xbf16, #tpu.memory_space<vmem>>, %arg5: memref<8x256xbf16, #tpu.memory_space<vmem>>, %arg6: memref<256x256xbf16, #tpu.memory_space<vmem>>, %arg7: memref<1x256xf32, #tpu.memory_space<vmem>>, %arg8: memref<1x256xf32, #tpu.memory_space<vmem>>, %arg9: memref<256x128xbf16, #tpu.memory_space<vmem>>, %arg10: memref<1x128xf32, #tpu.memory_space<vmem>>, %arg11: memref<16x128xf32, #tpu.memory_space<vmem>>, %arg12: memref<1x256xf32, #tpu.memory_space<vmem>>, %arg13: memref<1x256xf32, #tpu.memory_space<vmem>>) attributes {dimension_semantics = [#tpu.dimension_semantics<arbitrary>, #tpu.dimension_semantics<arbitrary>], iteration_bounds = array<i64: 2, 1>, scalar_prefetch = 0 : i64, scratch_operands = 2 : i64, tpu.core_type = #tpu.core_type<tc>, window_params = [{transform_indices = @transform_0, window_bounds = array<i64: 16, 32>}, {transform_indices = @transform_1, window_bounds = array<i64: 16, 1>}, {pipeline_mode = #tpu.pipeline_mode<synchronous>, transform_indices = @transform_2, window_bounds = array<i64: 32, 256>}, {pipeline_mode = #tpu.pipeline_mode<synchronous>, transform_indices = @transform_3, window_bounds = array<i64: 8, 256>}, {pipeline_mode = #tpu.pipeline_mode<synchronous>, transform_indices = @transform_4, window_bounds = array<i64: 256, 256>}, {pipeline_mode = #tpu.pipeline_mode<synchronous>, transform_indices = @transform_5, window_bounds = array<i64: 1, 256>}, {pipeline_mode = #tpu.pipeline_mode<synchronous>, transform_indices = @transform_6, window_bounds = array<i64: 1, 256>}, {pipeline_mode = #tpu.pipeline_mode<synchronous>, transform_indices = @transform_7, window_bounds = array<i64: 256, 128>}, {pipeline_mode = #tpu.pipeline_mode<synchronous>, transform_indices = @transform_8, window_bounds = array<i64: 1, 128>}, {transform_indices = @transform_9, window_bounds = array<i64: 16, 128>}]} {
    %c0 = arith.constant 0 : index
    %c0_0 = arith.constant 0 : index
    %0 = vector.load %arg3[%c0, %c0_0] : memref<16x1xi32, #tpu.memory_space<vmem>>, vector<16x1xi32>
    %1 = tpu.iota {dimensions = array<i32: 1>} : vector<16x8xi32>
    %2 = vector.broadcast %0 : vector<16x1xi32> to vector<16x8xi32>
    %3 = arith.cmpi eq, %2, %1 : vector<16x8xi32>
    %4 = arith.extui %3 : vector<16x8xi1> to vector<16x8xi32>
    %5 = arith.sitofp %4 : vector<16x8xi32> to vector<16x8xf32>
    %6 = arith.truncf %5 : vector<16x8xf32> to vector<16x8xbf16>
    %c0_1 = arith.constant 0 : index
    %c0_2 = arith.constant 0 : index
    %7 = vector.load %arg2[%c0_1, %c0_2] : memref<16x32xf32, #tpu.memory_space<vmem>>, vector<16x32xf32>
    %8 = arith.truncf %7 : vector<16x32xf32> to vector<16x32xbf16>
    %c0_3 = arith.constant 0 : index
    %c0_4 = arith.constant 0 : index
    %9 = vector.load %arg4[%c0_3, %c0_4] : memref<32x256xbf16, #tpu.memory_space<vmem>>, vector<32x256xbf16>
    %cst = arith.constant dense<0.000000e+00> : vector<16x256xf32>
    %10 = tpu.matmul %8, %9, %cst {dimension_numbers = #tpu.dot_dimension_numbers<[1], [0], [0], [1], [0, 0, 1, 1], [], []>} : vector<16x32xbf16>, vector<32x256xbf16>, vector<16x256xf32> -> vector<16x256xf32>
    %c0_5 = arith.constant 0 : index
    %c0_6 = arith.constant 0 : index
    %11 = vector.load %arg5[%c0_5, %c0_6] : memref<8x256xbf16, #tpu.memory_space<vmem>>, vector<8x256xbf16>
    %cst_7 = arith.constant dense<0.000000e+00> : vector<16x256xf32>
    %12 = tpu.matmul %6, %11, %cst_7 {dimension_numbers = #tpu.dot_dimension_numbers<[1], [0], [0], [1], [0, 0, 1, 1], [], []>} : vector<16x8xbf16>, vector<8x256xbf16>, vector<16x256xf32> -> vector<16x256xf32>
    %13 = arith.addf %10, %12 : vector<16x256xf32>
    %cst_8 = arith.constant 2.000000e-01 : f32
    %14 = vector.broadcast %cst_8 : f32 to vector<16x256xf32>
    %15 = arith.mulf %14, %13 : vector<16x256xf32>
    %16 = arith.maximumf %13, %15 : vector<16x256xf32>
    %17 = arith.truncf %16 : vector<16x256xf32> to vector<16x256xbf16>
    %c0_9 = arith.constant 0 : index
    %c0_10 = arith.constant 0 : index
    %18 = vector.load %arg6[%c0_9, %c0_10] : memref<256x256xbf16, #tpu.memory_space<vmem>>, vector<256x256xbf16>
    %cst_11 = arith.constant dense<0.000000e+00> : vector<16x256xf32>
    %19 = tpu.matmul %17, %18, %cst_11 {dimension_numbers = #tpu.dot_dimension_numbers<[1], [0], [0], [1], [0, 0, 1, 1], [], []>} : vector<16x256xbf16>, vector<256x256xbf16>, vector<16x256xf32> -> vector<16x256xf32>
    %c0_i32 = arith.constant 0 : i32
    %20 = arith.cmpi eq, %arg0, %c0_i32 : i32
    %c0_i32_12 = arith.constant 0 : i32
    %21 = arith.cmpi eq, %arg1, %c0_i32_12 : i32
    %22 = arith.andi %20, %21 : i1
    %23 = arith.extui %22 : i1 to i32
    %c0_i32_13 = arith.constant 0 : i32
    %24 = arith.cmpi ne, %23, %c0_i32_13 : i32
    scf.if %24 {
      %cst_17 = arith.constant 0.000000e+00 : f32
      %31 = vector.broadcast %cst_17 : f32 to vector<1x256xf32>
      %c0_18 = arith.constant 0 : index
      %c0_19 = arith.constant 0 : index
      %32 = vector.load %arg12[%c0_18, %c0_19] : memref<1x256xf32, #tpu.memory_space<vmem>>, vector<1x256xf32>
      tpu.vector_store %arg12[%c0_18, %c0_19], %31 {strides = array<i32>} : memref<1x256xf32, #tpu.memory_space<vmem>>, vector<1x256xf32>,
      %cst_20 = arith.constant 0.000000e+00 : f32
      %33 = vector.broadcast %cst_20 : f32 to vector<1x256xf32>
      %c0_21 = arith.constant 0 : index
      %c0_22 = arith.constant 0 : index
      %34 = vector.load %arg13[%c0_21, %c0_22] : memref<1x256xf32, #tpu.memory_space<vmem>>, vector<1x256xf32>
      tpu.vector_store %arg13[%c0_21, %c0_22], %33 {strides = array<i32>} : memref<1x256xf32, #tpu.memory_space<vmem>>, vector<1x256xf32>,
    } else {
    }
    %c0_i32_14 = arith.constant 0 : i32
    %25 = arith.cmpi eq, %arg0, %c0_i32_14 : i32
    %26 = arith.extui %25 : i1 to i32
    %c0_i32_15 = arith.constant 0 : i32
    %27 = arith.cmpi ne, %26, %c0_i32_15 : i32
    scf.if %27 {
      %c16_i32 = arith.constant 16 : i32
      %31 = arith.muli %arg1, %c16_i32 : i32
      %32 = tpu.iota {dimensions = array<i32: 0>} : vector<16x1xi32>
      %33 = vector.broadcast %31 : i32 to vector<16x1xi32>
      %34 = arith.addi %33, %32 : vector<16x1xi32>
      %c8_i32 = arith.constant 8 : i32
      %35 = vector.broadcast %c8_i32 : i32 to vector<16x1xi32>
      %36 = arith.cmpi slt, %34, %35 : vector<16x1xi32>
      %37 = arith.extui %36 : vector<16x1xi1> to vector<16x1xi32>
      %38 = arith.sitofp %37 : vector<16x1xi32> to vector<16x1xf32>
      %39 = vector.broadcast %38 : vector<16x1xf32> to vector<16x256xf32>
      %40 = arith.mulf %19, %39 : vector<16x256xf32>
      %c0_17 = arith.constant 0 : index
      %c0_18 = arith.constant 0 : index
      %41 = vector.load %arg12[%c0_17, %c0_18] : memref<1x256xf32, #tpu.memory_space<vmem>>, vector<1x256xf32>
      %cst_19 = arith.constant dense<0.000000e+00> : vector<256xf32>
      %42 = vector.multi_reduction <add>, %40, %cst_19 [0] : vector<16x256xf32> to vector<256xf32>
      %43 = vector.shape_cast %42 : vector<256xf32> to vector<1x256xf32>
      %44 = arith.addf %41, %43 : vector<1x256xf32>
      %c0_20 = arith.constant 0 : index
      %c0_21 = arith.constant 0 : index
      %45 = vector.load %arg12[%c0_20, %c0_21] : memref<1x256xf32, #tpu.memory_space<vmem>>, vector<1x256xf32>
      tpu.vector_store %arg12[%c0_20, %c0_21], %44 {strides = array<i32>} : memref<1x256xf32, #tpu.memory_space<vmem>>, vector<1x256xf32>,
      %c0_22 = arith.constant 0 : index
      %c0_23 = arith.constant 0 : index
      %46 = vector.load %arg13[%c0_22, %c0_23] : memref<1x256xf32, #tpu.memory_space<vmem>>, vector<1x256xf32>
      %47 = arith.mulf %40, %40 : vector<16x256xf32>
      %cst_24 = arith.constant dense<0.000000e+00> : vector<256xf32>
      %48 = vector.multi_reduction <add>, %47, %cst_24 [0] : vector<16x256xf32> to vector<256xf32>
      %49 = vector.shape_cast %48 : vector<256xf32> to vector<1x256xf32>
      %50 = arith.addf %46, %49 : vector<1x256xf32>
      %c0_25 = arith.constant 0 : index
      %c0_26 = arith.constant 0 : index
      %51 = vector.load %arg13[%c0_25, %c0_26] : memref<1x256xf32, #tpu.memory_space<vmem>>, vector<1x256xf32>
      tpu.vector_store %arg13[%c0_25, %c0_26], %50 {strides = array<i32>} : memref<1x256xf32, #tpu.memory_space<vmem>>, vector<1x256xf32>,
    } else {
    }
    %c1_i32 = arith.constant 1 : i32
    %28 = arith.cmpi eq, %arg0, %c1_i32 : i32
    %29 = arith.extui %28 : i1 to i32
    %c0_i32_16 = arith.constant 0 : i32
    %30 = arith.cmpi ne, %29, %c0_i32_16 : i32
    scf.if %30 {
      %c0_17 = arith.constant 0 : index
      %c0_18 = arith.constant 0 : index
      %31 = vector.load %arg12[%c0_17, %c0_18] : memref<1x256xf32, #tpu.memory_space<vmem>>, vector<1x256xf32>
      %cst_19 = arith.constant 1.250000e-01 : f32
      %32 = vector.broadcast %cst_19 : f32 to vector<1x256xf32>
      %33 = arith.mulf %31, %32 : vector<1x256xf32>
      %c0_20 = arith.constant 0 : index
      %c0_21 = arith.constant 0 : index
      %34 = vector.load %arg13[%c0_20, %c0_21] : memref<1x256xf32, #tpu.memory_space<vmem>>, vector<1x256xf32>
      %cst_22 = arith.constant 1.250000e-01 : f32
      %35 = vector.broadcast %cst_22 : f32 to vector<1x256xf32>
      %36 = arith.mulf %34, %35 : vector<1x256xf32>
      %37 = arith.mulf %33, %33 : vector<1x256xf32>
      %38 = arith.subf %36, %37 : vector<1x256xf32>
      %cst_23 = arith.constant 0.000000e+00 : f32
      %39 = vector.broadcast %cst_23 : f32 to vector<1x256xf32>
      %40 = arith.maximumf %38, %39 : vector<1x256xf32>
      %c0_24 = arith.constant 0 : index
      %c0_25 = arith.constant 0 : index
      %41 = vector.load %arg7[%c0_24, %c0_25] : memref<1x256xf32, #tpu.memory_space<vmem>>, vector<1x256xf32>
      %cst_26 = arith.constant 9.99999974E-6 : f32
      %42 = vector.broadcast %cst_26 : f32 to vector<1x256xf32>
      %43 = arith.addf %40, %42 : vector<1x256xf32>
      %44 = math.rsqrt %43 : vector<1x256xf32>
      %45 = arith.mulf %41, %44 : vector<1x256xf32>
      %c0_27 = arith.constant 0 : index
      %c0_28 = arith.constant 0 : index
      %46 = vector.load %arg8[%c0_27, %c0_28] : memref<1x256xf32, #tpu.memory_space<vmem>>, vector<1x256xf32>
      %47 = arith.mulf %33, %45 : vector<1x256xf32>
      %48 = arith.subf %46, %47 : vector<1x256xf32>
      %49 = vector.broadcast %45 : vector<1x256xf32> to vector<16x256xf32>
      %50 = arith.mulf %19, %49 : vector<16x256xf32>
      %51 = vector.broadcast %48 : vector<1x256xf32> to vector<16x256xf32>
      %52 = arith.addf %50, %51 : vector<16x256xf32>
      %cst_29 = arith.constant 2.000000e-01 : f32
      %53 = vector.broadcast %cst_29 : f32 to vector<16x256xf32>
      %54 = arith.mulf %53, %52 : vector<16x256xf32>
      %55 = arith.maximumf %52, %54 : vector<16x256xf32>
      %56 = arith.truncf %55 : vector<16x256xf32> to vector<16x256xbf16>
      %c0_30 = arith.constant 0 : index
      %c0_31 = arith.constant 0 : index
      %57 = vector.load %arg9[%c0_30, %c0_31] : memref<256x128xbf16, #tpu.memory_space<vmem>>, vector<256x128xbf16>
      %cst_32 = arith.constant dense<0.000000e+00> : vector<16x128xf32>
      %58 = tpu.matmul %56, %57, %cst_32 {dimension_numbers = #tpu.dot_dimension_numbers<[1], [0], [0], [1], [0, 0, 1, 1], [], []>} : vector<16x256xbf16>, vector<256x128xbf16>, vector<16x128xf32> -> vector<16x128xf32>
      %c0_33 = arith.constant 0 : index
      %c0_34 = arith.constant 0 : index
      %59 = vector.load %arg10[%c0_33, %c0_34] : memref<1x128xf32, #tpu.memory_space<vmem>>, vector<1x128xf32>
      %60 = vector.broadcast %59 : vector<1x128xf32> to vector<16x128xf32>
      %61 = arith.addf %58, %60 : vector<16x128xf32>
      %62 = math.tanh %61 : vector<16x128xf32>
      %cst_35 = arith.constant 5.000000e-01 : f32
      %63 = vector.broadcast %cst_35 : f32 to vector<16x128xf32>
      %64 = arith.mulf %62, %63 : vector<16x128xf32>
      %cst_36 = arith.constant 5.000000e-01 : f32
      %65 = vector.broadcast %cst_36 : f32 to vector<16x128xf32>
      %66 = arith.addf %64, %65 : vector<16x128xf32>
      %c0_37 = arith.constant 0 : index
      %c0_38 = arith.constant 0 : index
      %67 = vector.load %arg11[%c0_37, %c0_38] : memref<16x128xf32, #tpu.memory_space<vmem>>, vector<16x128xf32>
      tpu.vector_store %arg11[%c0_37, %c0_38], %66 {strides = array<i32>} : memref<16x128xf32, #tpu.memory_space<vmem>>, vector<16x128xf32>,
    } else {
    }
    return
  }
  func.func @transform_0(%arg0: i32, %arg1: i32) -> (i32, i32) {
    %c0_i32 = arith.constant 0 : i32
    %c0_i32_0 = arith.constant 0 : i32
    return %arg1, %c0_i32 : i32, i32
  }
  func.func @transform_1(%arg0: i32, %arg1: i32) -> (i32, i32) {
    %c0_i32 = arith.constant 0 : i32
    %c0_i32_0 = arith.constant 0 : i32
    return %arg1, %c0_i32 : i32, i32
  }
  func.func @transform_2(%arg0: i32, %arg1: i32) -> (i32, i32) {
    %c0_i32 = arith.constant 0 : i32
    %c0_i32_0 = arith.constant 0 : i32
    %c0_i32_1 = arith.constant 0 : i32
    return %c0_i32, %c0_i32_0 : i32, i32
  }
  func.func @transform_3(%arg0: i32, %arg1: i32) -> (i32, i32) {
    %c0_i32 = arith.constant 0 : i32
    %c0_i32_0 = arith.constant 0 : i32
    %c0_i32_1 = arith.constant 0 : i32
    return %c0_i32, %c0_i32_0 : i32, i32
  }
  func.func @transform_4(%arg0: i32, %arg1: i32) -> (i32, i32) {
    %c0_i32 = arith.constant 0 : i32
    %c0_i32_0 = arith.constant 0 : i32
    %c0_i32_1 = arith.constant 0 : i32
    return %c0_i32, %c0_i32_0 : i32, i32
  }
  func.func @transform_5(%arg0: i32, %arg1: i32) -> (i32, i32) {
    %c0_i32 = arith.constant 0 : i32
    %c0_i32_0 = arith.constant 0 : i32
    %c0_i32_1 = arith.constant 0 : i32
    return %c0_i32, %c0_i32_0 : i32, i32
  }
  func.func @transform_6(%arg0: i32, %arg1: i32) -> (i32, i32) {
    %c0_i32 = arith.constant 0 : i32
    %c0_i32_0 = arith.constant 0 : i32
    %c0_i32_1 = arith.constant 0 : i32
    return %c0_i32, %c0_i32_0 : i32, i32
  }
  func.func @transform_7(%arg0: i32, %arg1: i32) -> (i32, i32) {
    %c0_i32 = arith.constant 0 : i32
    %c0_i32_0 = arith.constant 0 : i32
    %c0_i32_1 = arith.constant 0 : i32
    return %c0_i32, %c0_i32_0 : i32, i32
  }
  func.func @transform_8(%arg0: i32, %arg1: i32) -> (i32, i32) {
    %c0_i32 = arith.constant 0 : i32
    %c0_i32_0 = arith.constant 0 : i32
    %c0_i32_1 = arith.constant 0 : i32
    return %c0_i32, %c0_i32_0 : i32, i32
  }
  func.func @transform_9(%arg0: i32, %arg1: i32) -> (i32, i32) {
    %0 = arith.muli %arg1, %arg0 : i32
    %c0_i32 = arith.constant 0 : i32
    %c0_i32_0 = arith.constant 0 : i32
    return %0, %c0_i32 : i32, i32
  }
}

</mosaic_0001>

<bundles_post_ra>
// kernel: generator_forward.1
= control target key start
LH: loop header
LB: loop body
LE: loop exit
PB: predicated region body
PF: predicated region fallthrough
CT: control target
= control target key end

     0   :  { %14 = vsyncpa [#allocation5], 0  ;;  %s1838_s0 = inlined_call_operand.vmem [shape: f32[16,32], index: 0, kind: input, shape index: {}]   ;;  %s1839_s1 = inlined_call_operand.vmem [shape: s32[16,1], index: 1, kind: input, shape index: {}]   ;;  %s1840_s2 = inlined_call_operand.vmem [shape: bf16[32,256], index: 2, kind: input, shape index: {}]   ;;  %s1841_s3 = inlined_call_operand.vmem [shape: bf16[8,256], index: 3, kind: input, shape index: {}]   ;;  %s1842_s4 = inlined_call_operand.hbm [shape: bf16[256,256], index: 4, kind: input, shape index: {}]   ;;  %s1843_s5 = inlined_call_operand.vmem [shape: f32[1,256], index: 5, kind: input, shape index: {}]   ;;  %s1844_s6 = inlined_call_operand.vmem [shape: f32[1,256], index: 6, kind: input, shape index: {}]   ;;  %s1845_s7 = inlined_call_operand.hbm [shape: bf16[256,128], index: 7, kind: input, shape index: {}]   ;;  %s1846_s8 = inlined_call_operand.vmem [shape: f32[1,128], index: 8, kind: input, shape index: {}]   ;;  %s1847_s9 = inlined_call_operand.vmem [shape: f32[16,128], index: 9, kind: output, shape index: {}]  }
   0x1   :  { %15 = vsyncpa [#allocation7], 0  ;;  %s1700_s30 = smov 0   ;;  %s1702_s10 = smov 0  }
   0x2   :  { %s1704_s11 = smov 0  }
   0x3 LB: > { %s1205_s12 = sadd.s32 4294967295, %s1639_s11   ;;  %s33_s13 = sadd.s32 1, %s1635_s10  ;;  %s1639_s11 = sphi %s1704_s11, %s21_s11   ;;  %s1635_s10 = sphi %s1702_s10, %s1851_s10   ;;  %s1631_s30 = sphi %s1700_s30, %s1850_s30  }
   0x4   : > { %p35_p0 = scmp.ge.s32.totalorder %s33_s13, 2  ;;  %p1207_p1 = scmp.ge.s32.totalorder %s1639_s11, 1 }
   0x5   : > { %p265_p2 = scmp.lt.s32.totalorder %s1639_s11, 3  ;;  %p1725_p4 = scmp.eq.s32.totalorder %s1205_s12, 0 }
   0x6   : > { %s1853_s13 = smov (%p35_p0, %s33_s13), 0  ;;  %s300_s18 = sshll.u32 %s1842_s4, 4  ;;  %s301_s18 = int_to_ptr.hbm [resolvable:$true] %s300_s18 }
   0x7   : > { %p1721_p3 = pnand %p1207_p1, %p265_p2  ;;  %s1641_s19 = smov [#allocation4]  }
   0x8   : > { %s302_s20 = sshll.u32 %s1641_s19, 4  ;;  %s320_s23 = sshll.u32 %s1845_s7, 4  ;;  %s303_s20 = int_to_ptr.vmem [resolvable:$true] %s302_s20  ;;  %s321_s23 = int_to_ptr.hbm [resolvable:$true] %s320_s23 }
   0x9   : > { %p1497_p5 = pneg %p1721_p3  ;;  %s1642_s24 = smov 128  }
   0xa   : > { %s1643_s25 = smov 8   ;;  %s1644_s26 = smov [#allocation6]  }
   0xb   : > { %p1498_p6 = pnand %p1725_p4, %p1497_p5  ;;  %s322_s27 = sshll.u32 %s1644_s26, 4  ;;  %s323_s27 = int_to_ptr.vmem [resolvable:$true] %s322_s27 }
   0xc   : > { %s1645_s28 = smov 64   ;;  %s1646_s29 = smov 4  }
   0xd   : > { %1500 = dma.hbm_to_vmem [thread:$0]  (!%p1498_p6), %s301_s18, 4096, %s303_s20, [#allocation5], %s1642_s24, %s1642_s24, %s1643_s25  }
   0xe   : > { %1503 = dma.hbm_to_vmem [thread:$0]  (!%p1498_p6), %s321_s23, 2048, %s323_s27, [#allocation7], %s1645_s28, %s1645_s28, %s1646_s29  }
   0xf   : > { %341 = sbr.rel (%p1721_p3) target bundleno = 671 (0x29f), region = 56 }
  0x14   : > { %1622 = dma.done.wait (%p1725_p4), [#allocation5], 4096  }
  0x15   : > { %1624 = vsyncadd (%p1725_p4), [#allocation5], 4294963200 }
  0x16   : > { %1626 = dma.done.wait (%p1725_p4), [#allocation7], 2048  }
  0x17   : > { %1628 = vsyncadd (%p1725_p4), [#allocation7], 4294965248  ;;  %v1647_v0 = vmov 0   ;;  %v410_v1 = vld [vmem:[%s1839_s1] sm:$0xff]  ;;  %v1229_v2 = vld [vmem:[%s1840_s2 + $0x10] sm:$0xf] }
  0x18   : > { %1541 = vset.pattern.permute.xlu0 %v1647_v0  ;;  %v1439_v3 = vld [vmem:[%s1840_s2 + $0x14] sm:$0xf0]  ;;  %v1438_v4 = vld [vmem:[%s1840_s2 + $0x14] sm:$0xf]  ;;  %v1231_v5 = vld [vmem:[%s1840_s2 + $0x18] sm:$0xf0] }
  0x19   : > { %415 = vperm.xlu0 %1541, %v410_v1   ;;  %v1230_v6 = vor.u32 %v1439_v3, %v1229_v2  ;;  %v1234_v7 = vor.u32 %v1438_v4, %v1231_v5  ;;  %v1221_v8 = vld [vmem:[%s1840_s2] sm:$0xf]  ;;  %v1437_v9 = vld [vmem:[%s1840_s2 + $0x4] sm:$0xf0]  ;;  %v1436_v10 = vld [vmem:[%s1840_s2 + $0x4] sm:$0xf]  ;;  %v412_v1 = vlaneseq }
  0x1a   : > { %v1223_v11 = vld [vmem:[%s1840_s2 + $0x8] sm:$0xf0]  ;;  %v1222_v12 = vor.u32 %v1437_v9, %v1221_v8  ;;  %v427_v14 = vld [vmem:[%s1838_s0] sm:$0xff]  ;;  %vm499_vm0 = vcmask 261120   ;;  %vm444_vm1 = vcmask 1043456   ;;  %vm440_vm4 = vcmask 64512  }
  0x1b   : > { %509 = vmatpush.bf16.msra.mxu2 %v1230_v6  ;;  %523 = vmatpush.bf16.msra.mxu3 %v1234_v7  ;;  %v1226_v13 = vor.u32 %v1436_v10, %v1223_v11  ;;  %v428_v15 = vld [vmem:[%s1838_s0 + $0x8] sm:$0xff]  ;;  %v434_v18 = vld [vmem:[%s1841_s3] sm:$0xff]  ;;  %v1295_v25 = vld [vmem:[#allocation4 + $0x70] sm:$0xf]  ;;  %v413_v11 = vand.u32 127, %v412_v1  ;;  %p789_p7 = scmp.eq.s32.totalorder %s1631_s30, 0 }
  0x1c   : > { %v411_v16 = vld [vmem:[%s1839_s1 + $0x8] sm:$0xff]  ;;  %v429_v17 = vpack.c.bf16 %v428_v15, %v427_v14  ;;  %v436_v19 = vunpack.c.l.b16 %v434_v18  ;;  %v437_v20 = vunpack.c.h.b16 %v434_v18  ;;  %v1455_v26 = vld [vmem:[#allocation4 + $0x74] sm:$0xf0]  ;;  %v1359_v27 = vld [vmem:[#allocation4 + $0xf0] sm:$0xf]  ;;  %vm797_vm5 = vcmp.lt.s32.totalorder (%p789_p7), %v412_v1, 256 }
  0x1d   : > { %v1296_v28 = vor.u32 %v1455_v26, %v1295_v25  ;;  %v1471_v29 = vld [vmem:[#allocation4 + $0xf4] sm:$0xf0]  ;;  %v1454_v30 = vld [vmem:[#allocation4 + $0x74] sm:$0xf]  ;;  %v1297_v31 = vld [vmem:[#allocation4 + $0x78] sm:$0xf0] }
  0x1e   : > { %v438_v21 = vpack.c.b16 %v436_v19, %v436_v19  ;;  %v439_v22 = vpack.c.b16 %v437_v20, %v437_v20  ;;  %v1360_v32 = vor.u32 %v1471_v29, %v1359_v27  ;;  %v1300_v33 = vor.u32 %v1454_v30, %v1297_v31  ;;  %v1470_v34 = vld [vmem:[#allocation4 + $0xf4] sm:$0xf]  ;;  %v1361_v35 = vld [vmem:[#allocation4 + $0xf8] sm:$0xf0]  ;;  %v1287_v36 = vld [vmem:[#allocation4 + $0x60] sm:$0xf] }
  0x1f   : > { %510 = vmatpush.bf16.msra.mxu2 %v1222_v12  ;;  %524 = vmatpush.bf16.msra.mxu3 %v1226_v13  ;;  %v1364_v37 = vor.u32 %v1470_v34, %v1361_v35  ;;  %v1453_v38 = vld [vmem:[#allocation4 + $0x64] sm:$0xf0]  ;;  %v1351_v39 = vld [vmem:[#allocation4 + $0xe0] sm:$0xf]  ;;  %v1452_v43 = vld [vmem:[#allocation4 + $0x64] sm:$0xf] }
  0x20   : > { %v446_v23 = vsel %vm444_vm1, %v438_v21, 0  ;;  %v449_v24 = vsel %vm444_vm1, %v439_v22, 0  ;;  %v1469_v40 = vld [vmem:[#allocation4 + $0xe4] sm:$0xf0]  ;;  %v1288_v41 = vor.u32 %v1453_v38, %v1287_v36  ;;  %v1289_v44 = vld [vmem:[#allocation4 + $0x68] sm:$0xf0] }
  0x21   : > { %418 = vperm.xlu0 %1541, %v411_v16   ;;  %458 = vmatpush.bf16.msra.mxu0 %v446_v23  ;;  %v1352_v42 = vor.u32 %v1469_v40, %v1351_v39  ;;  %v1468_v45 = vld [vmem:[#allocation4 + $0xe4] sm:$0xf]  ;;  %v1292_v46 = vor.u32 %v1452_v43, %v1289_v44  ;;  %v1353_v47 = vld [vmem:[#allocation4 + $0xe8] sm:$0xf0]  ;;  %v1279_v49 = vld [vmem:[#allocation4 + $0x50] sm:$0xf] }
  0x22   : > { %1235 = vmatmul.msk.bf16.vlgmr.msra.gmra.mxu2 %vm499_vm0, %v429_v17  ;;  %1236 = vmatmul.msk.bf16.vlgmr.msra.gmra.mxu3 %vm499_vm0, %v429_v17  ;;  %v1356_v48 = vor.u32 %v1468_v45, %v1353_v47  ;;  %v1451_v50 = vld [vmem:[#allocation4 + $0x54] sm:$0xf0]  ;;  %v1343_v51 = vld [vmem:[#allocation4 + $0xd0] sm:$0xf]  ;;  %v1450_v54 = vld [vmem:[#allocation4 + $0x54] sm:$0xf] }
  0x23   : > { %472 = vmatpush.bf16.msra.mxu1 %v449_v24  ;;  %761 = vmatpush.bf16.msrb.mxu2 %v1300_v33  ;;  %v1280_v52 = vor.u32 %v1451_v50, %v1279_v49  ;;  %v1467_v53 = vld [vmem:[#allocation4 + $0xd4] sm:$0xf0]  ;;  %v1281_v55 = vld [vmem:[#allocation4 + $0x58] sm:$0xf0]  ;;  %v1466_v58 = vld [vmem:[#allocation4 + $0xd4] sm:$0xf] }
  0x24   : > { %775 = vmatpush.bf16.msrb.mxu3 %v1364_v37  ;;  %v1344_v56 = vor.u32 %v1467_v53, %v1343_v51  ;;  %v1284_v57 = vor.u32 %v1450_v54, %v1281_v55  ;;  %v1345_v59 = vld [vmem:[#allocation4 + $0xd8] sm:$0xf0]  ;;  %v1271_v60 = vld [vmem:[#allocation4 + $0x40] sm:$0xf]  ;;  %v1449_v62 = vld [vmem:[#allocation4 + $0x44] sm:$0xf0] }
  0x25   : > { %733 = vmatpush.bf16.msrb.mxu0 %v1296_v28  ;;  %v1348_v61 = vor.u32 %v1466_v58, %v1345_v59  ;;  %v1335_v63 = vld [vmem:[#allocation4 + $0xc0] sm:$0xf]  ;;  %v1465_v0 = vld [vmem:[#allocation4 + $0xc4] sm:$0xf0]  ;;  %v1272_v2 = vor.u32 %v1449_v62, %v1271_v60  ;;  %v1448_v4 = vld [vmem:[#allocation4 + $0x44] sm:$0xf] }
  0x26   : > { %v1336_v3 = vor.u32 %v1465_v0, %v1335_v63  ;;  %v1273_v5 = vld [vmem:[#allocation4 + $0x48] sm:$0xf0]  ;;  %v1464_v6 = vld [vmem:[#allocation4 + $0xc4] sm:$0xf]  ;;  %v1648_v13 = vmov 0.0  }
  0x27   : > { %747 = vmatpush.bf16.msrb.mxu1 %v1360_v32  ;;  %762 = vmatpush.bf16.msrb.mxu2 %v1292_v46  ;;  %v1276_v8 = vor.u32 %v1448_v4, %v1273_v5  ;;  %v1337_v9 = vld [vmem:[#allocation4 + $0xc8] sm:$0xf0]  ;;  %v1263_v17 = vld [vmem:[#allocation4 + $0x30] sm:$0xf]  ;;  %v1447_v18 = vld [vmem:[#allocation4 + $0x34] sm:$0xf0] }
  0x28   : > { %776 = vmatpush.bf16.msrb.mxu3 %v1356_v48  ;;  %v1340_v10 = vor.u32 %v1464_v6, %v1337_v9  ;;  %v1327_v19 = vld [vmem:[#allocation4 + $0xb0] sm:$0xf]  ;;  %v1264_v20 = vor.u32 %v1447_v18, %v1263_v17  ;;  %v1463_v21 = vld [vmem:[#allocation4 + $0xb4] sm:$0xf0]  ;;  %v1446_v22 = vld [vmem:[#allocation4 + $0x34] sm:$0xf] }
  0x29   : > { %734 = vmatpush.bf16.msrb.mxu0 %v1288_v41  ;;  %v1265_v23 = vld [vmem:[#allocation4 + $0x38] sm:$0xf0]  ;;  %v1328_v24 = vor.u32 %v1463_v21, %v1327_v19  ;;  %v1462_v26 = vld [vmem:[#allocation4 + $0xb4] sm:$0xf]  ;;  %v1255_v29 = vld [vmem:[#allocation4 + $0x20] sm:$0xf] }
  0x2a   : > { %v1268_v25 = vor.u32 %v1446_v22, %v1265_v23  ;;  %v1329_v27 = vld [vmem:[#allocation4 + $0xb8] sm:$0xf0]  ;;  %v1445_v30 = vld [vmem:[#allocation4 + $0x24] sm:$0xf0]  ;;  %v1319_v31 = vld [vmem:[#allocation4 + $0xa0] sm:$0xf] }
  0x2b   : > { %748 = vmatpush.bf16.msrb.mxu1 %v1352_v42  ;;  %763 = vmatpush.bf16.msrb.mxu2 %v1284_v57  ;;  %v1332_v28 = vor.u32 %v1462_v26, %v1329_v27  ;;  %v1256_v32 = vor.u32 %v1445_v30, %v1255_v29  ;;  %v1461_v33 = vld [vmem:[#allocation4 + $0xa4] sm:$0xf0]  ;;  %v1444_v34 = vld [vmem:[#allocation4 + $0x24] sm:$0xf]  ;;  %v1257_v35 = vld [vmem:[#allocation4 + $0x28] sm:$0xf0] }
  0x2c   : > { %777 = vmatpush.bf16.msrb.mxu3 %v1348_v61  ;;  %v1320_v36 = vor.u32 %v1461_v33, %v1319_v31  ;;  %v1260_v37 = vor.u32 %v1444_v34, %v1257_v35  ;;  %v1460_v38 = vld [vmem:[#allocation4 + $0xa4] sm:$0xf]  ;;  %v1321_v39 = vld [vmem:[#allocation4 + $0xa8] sm:$0xf0]  ;;  %v1247_v41 = vld [vmem:[#allocation4 + $0x10] sm:$0xf] }
  0x2d   : > { %735 = vmatpush.bf16.msrb.mxu0 %v1280_v52  ;;  %v1324_v40 = vor.u32 %v1460_v38, %v1321_v39  ;;  %v1443_v42 = vld [vmem:[#allocation4 + $0x14] sm:$0xf0]  ;;  %v1311_v43 = vld [vmem:[#allocation4 + $0x90] sm:$0xf]  ;;  %v1442_v46 = vld [vmem:[#allocation4 + $0x14] sm:$0xf] }
  0x2e   : > { %v1248_v44 = vor.u32 %v1443_v42, %v1247_v41  ;;  %v1459_v45 = vld [vmem:[#allocation4 + $0x94] sm:$0xf0]  ;;  %v1249_v47 = vld [vmem:[#allocation4 + $0x18] sm:$0xf0]  ;;  %v1458_v50 = vld [vmem:[#allocation4 + $0x94] sm:$0xf] }
  0x2f   : > { %749 = vmatpush.bf16.msrb.mxu1 %v1344_v56  ;;  %764 = vmatpush.bf16.msrb.mxu2 %v1276_v8  ;;  %v1312_v48 = vor.u32 %v1459_v45, %v1311_v43  ;;  %v1252_v49 = vor.u32 %v1442_v46, %v1249_v47  ;;  %v1313_v51 = vld [vmem:[#allocation4 + $0x98] sm:$0xf0]  ;;  %v1239_v53 = vld [vmem:[#allocation4] sm:$0xf]  ;;  %v1441_v54 = vld [vmem:[#allocation4 + $0x4] sm:$0xf0] }
  0x30   : > { %778 = vmatpush.bf16.msrb.mxu3 %v1340_v10  ;;  %v1316_v52 = vor.u32 %v1458_v50, %v1313_v51  ;;  %v1303_v55 = vld [vmem:[#allocation4 + $0x80] sm:$0xf]  ;;  %v1240_v56 = vor.u32 %v1441_v54, %v1239_v53  ;;  %v1457_v57 = vld [vmem:[#allocation4 + $0x84] sm:$0xf0]  ;;  %v1440_v58 = vld [vmem:[#allocation4 + $0x4] sm:$0xf] }
  0x31   : > { %736 = vmatpush.bf16.msrb.mxu0 %v1272_v2  ;;  %v1241_v59 = vld [vmem:[#allocation4 + $0x8] sm:$0xf0]  ;;  %v1304_v60 = vor.u32 %v1457_v57, %v1303_v55  ;;  %v1456_v62 = vld [vmem:[#allocation4 + $0x84] sm:$0xf] }
  0x32   : > { %v1244_v61 = vor.u32 %v1440_v58, %v1241_v59  ;;  %v1305_v63 = vld [vmem:[#allocation4 + $0x88] sm:$0xf0] }
  0x33   : > { %750 = vmatpush.bf16.msrb.mxu1 %v1336_v3  ;;  %765 = vmatpush.bf16.msrb.mxu2 %v1268_v25  ;;  %v1308_v0 = vor.u32 %v1456_v62, %v1305_v63 }
  0x34   : > { %779 = vmatpush.bf16.msrb.mxu3 %v1332_v28 }
  0x35   : > { %737 = vmatpush.bf16.msrb.mxu0 %v1264_v20 }
  0x37   : > { %751 = vmatpush.bf16.msrb.mxu1 %v1328_v24  ;;  %766 = vmatpush.bf16.msrb.mxu2 %v1260_v37 }
  0x38   : > { %780 = vmatpush.bf16.msrb.mxu3 %v1324_v40 }
  0x39   : > { %738 = vmatpush.bf16.msrb.mxu0 %v1256_v32 }
  0x3b   : > { %752 = vmatpush.bf16.msrb.mxu1 %v1320_v36  ;;  %767 = vmatpush.bf16.msrb.mxu2 %v1252_v49  ;;  %v1649_v36 = vmov (%p789_p7), 0.0  }
  0x3c   : > { %781 = vmatpush.bf16.msrb.mxu3 %v1316_v52  ;;  %799 = vst.msk [vmem:[#allocation2] sm:$0x3] (%p789_p7), %vm797_vm5, %v1649_v36 }
  0x3d   : > { %739 = vmatpush.bf16.msrb.mxu0 %v1248_v44  ;;  %800 = vst.msk [vmem:[#allocation3] sm:$0x3] (%p789_p7), %vm797_vm5, %v1649_v36 }
  0x3f   : > { %753 = vmatpush.bf16.msrb.mxu1 %v1312_v48  ;;  %768 = vmatpush.bf16.msrb.mxu2 %v1244_v61 }
  0x40   : > { %782 = vmatpush.bf16.msrb.mxu3 %v1308_v0 }
  0x41   : > { %740 = vmatpush.bf16.msrb.mxu0 %v1240_v56 }
  0x43   : > { %754 = vmatpush.bf16.msrb.mxu1 %v1304_v60 }
  0x8b   : > { %v416_v7 = vpop.permute.xlu0 %415 }
  0x8c   : > { %vm420_vm2 = vcmp.eq.s32.totalorder %v416_v7, %v413_v11 }
  0x8d   : > { %v1215_v14 = vsel %vm420_vm2, 1.0, %v1648_v13 }
  0x93   : > { %v419_v12 = vpop.permute.xlu0 %418 }
  0x94   : > { %vm421_vm3 = vcmp.eq.s32.totalorder %v419_v12, %v413_v11 }
  0x95   : > { %v1216_v15 = vsel %vm421_vm3, 1.0, %v1648_v13 }
  0x96   : > { %v426_v16 = vpack.c.bf16 %v1216_v15, %v1215_v14 }
  0x98   : > { %1217 = vmatmul.msk.bf16.vlgmr.msra.gmra.mxu0 %vm440_vm4, %v426_v16  ;;  %1218 = vmatmul.msk.bf16.vlgmr.msra.gmra.mxu1 %vm440_vm4, %v426_v16 }
  0xa5   : > { %v512_v2 = vpop.f32.mrf.mxu2  ;;  %v526_v3 = vpop.f32.mrf.mxu3 }
  0xad   : > { %v514_v8 = vpop.f32.mrf.mxu2  ;;  %v528_v9 = vpop.f32.mrf.mxu3 }
 0x115   : > { %v460_v4 = vpop.f32.mrf.mxu0  ;;  %v474_v5 = vpop.f32.mrf.mxu1 }
 0x116   : > { %v513_v6 = vadd.f32 %v512_v2, %v460_v4  ;;  %v527_v7 = vadd.f32 %v526_v3, %v474_v5 }
 0x118   : > { %v531_v12 = vmul.f32 0.2, %v513_v6  ;;  %v532_v13 = vmul.f32 0.2, %v527_v7 }
 0x11a   : > { %v535_v18 = vmax.f32 %v513_v6, %v531_v12  ;;  %v536_v19 = vmax.f32 %v527_v7, %v532_v13 }
 0x11d   : > { %v462_v10 = vpop.f32.mrf.mxu0  ;;  %v476_v11 = vpop.f32.mrf.mxu1 }
 0x11e   : > { %v515_v14 = vadd.f32 %v514_v8, %v462_v10  ;;  %v529_v15 = vadd.f32 %v528_v9, %v476_v11 }
 0x120   : > { %v533_v16 = vmul.f32 0.2, %v515_v14  ;;  %v534_v17 = vmul.f32 0.2, %v529_v15 }
 0x122   : > { %v537_v20 = vmax.f32 %v515_v14, %v533_v16  ;;  %v538_v21 = vmax.f32 %v529_v15, %v534_v17 }
 0x124   : > { %v539_v22 = vpack.c.bf16 %v537_v20, %v535_v18  ;;  %v540_v23 = vpack.c.bf16 %v538_v21, %v536_v19 }
 0x126   : > { %741 = vmatmul.bf16.vlgmr.msrb.gmra.mxu0 %v539_v22  ;;  %755 = vmatmul.bf16.vlgmr.msrb.gmra.mxu1 %v540_v23 }
 0x127   : > { %769 = vmatmul.bf16.vlgmr.msrb.gmra.mxu2 %v539_v22  ;;  %783 = vmatmul.bf16.vlgmr.msrb.gmra.mxu3 %v540_v23 }
 0x1a3   : > { %v742_v24 = vpop.f32.mrf.mxu0  ;;  %v756_v25 = vpop.f32.mrf.mxu1 }
 0x1a4   : > { %v1790_v26 = vadd.f32 %v756_v25, %v742_v24 }
 0x1aa   : > { %v770_v27 = vpop.f32.mrf.mxu2  ;;  %v784_v28 = vpop.f32.mrf.mxu3 }
 0x1ab   : > { %v1792_v29 = vadd.f32 %v784_v28, %v770_v27  ;;  %v744_v30 = vpop.f32.mrf.mxu0  ;;  %v758_v31 = vpop.f32.mrf.mxu1 }
 0x1ac   : > { %v1794_v32 = vadd.f32 %v758_v31, %v744_v30 }
 0x1af   : > { %794 = sbr.rel (!%p789_p7) target bundleno = 436 (0x1b4), region = 68 }
 0x1b2   : > { %v772_v33 = vpop.f32.mrf.mxu2  ;;  %v786_v34 = vpop.f32.mrf.mxu3 }
 0x1b3   : > { %v1796_v35 = vadd.f32 %v786_v34, %v772_v33 }
 0x1b4 PF: > { %p1366_p8 = scmp.ne.s32.totalorder %s1631_s30, 0 }
 0x1b6   : > { %803 = sbr.rel (%p1366_p8) target bundleno = 467 (0x1d3), region = 72 }
 0x1bb   : > { %v819_v37 = vmul.f32 0.0, %v1794_v32  ;;  %v820_v38 = vmul.f32 0.0, %v1796_v35  ;;  %v849_v39 = vmul.f32 %v1790_v26, %v1790_v26  ;;  %v850_v40 = vmul.f32 %v1792_v29, %v1792_v29  ;;  %v821_v6 = vld [vmem:[#allocation2] sm:$0x3]  ;;  %v848_v11 = vld [vmem:[#allocation3] sm:$0x3] }
 0x1bc   : > { %vm839_vm6 = vcmask 1040384   ;;  %vm845_vm7 = vcmp.lt.s32.totalorder %v412_v1, 256 }
 0x1bd   : > { %v822_v41 = vadd.f32 %v819_v37, %v1790_v26  ;;  %v829_v42 = vadd.f32 %v820_v38, %v1792_v29  ;;  %v851_v43 = vmul.f32 %v819_v37, %v819_v37  ;;  %v852_v44 = vmul.f32 %v820_v38, %v820_v38 }
 0x1bf   : > { %v823_v45 = vrot.slane %v822_v41, 4  ;;  %v830_v46 = vrot.slane %v829_v42, 4  ;;  %v853_v47 = vadd.f32 %v851_v43, %v849_v39  ;;  %v860_v48 = vadd.f32 %v852_v44, %v850_v40 }
 0x1c1   : > { %v824_v49 = vadd.f32 %v823_v45, %v822_v41  ;;  %v831_v50 = vadd.f32 %v830_v46, %v829_v42  ;;  %v854_v51 = vrot.slane %v853_v47, 4  ;;  %v861_v52 = vrot.slane %v860_v48, 4 }
 0x1c3   : > { %v825_v53 = vrot.slane %v824_v49, 2  ;;  %v832_v54 = vrot.slane %v831_v50, 2  ;;  %v855_v55 = vadd.f32 %v854_v51, %v853_v47  ;;  %v862_v56 = vadd.f32 %v861_v52, %v860_v48 }
 0x1c5   : > { %v826_v57 = vadd.f32 %v825_v53, %v824_v49  ;;  %v833_v58 = vadd.f32 %v832_v54, %v831_v50  ;;  %v856_v59 = vrot.slane %v855_v55, 2  ;;  %v863_v60 = vrot.slane %v862_v56, 2 }
 0x1c7   : > { %v827_v61 = vrot.slane %v826_v57, 1  ;;  %v834_v62 = vrot.slane %v833_v58, 1  ;;  %v857_v63 = vadd.f32 %v856_v59, %v855_v55  ;;  %v864_v0 = vadd.f32 %v863_v60, %v862_v56 }
 0x1c9   : > { %v828_v2 = vadd.f32 %v827_v61, %v826_v57  ;;  %v835_v3 = vadd.f32 %v834_v62, %v833_v58  ;;  %v858_v4 = vrot.slane %v857_v63, 1  ;;  %v865_v5 = vrot.slane %v864_v0, 1 }
 0x1cb   : > { %v838_v7 = vrot.slane %v835_v3, 7  ;;  %v859_v8 = vadd.f32 %v858_v4, %v857_v63  ;;  %v866_v9 = vadd.f32 %v865_v5, %v864_v0 }
 0x1cd   : > { %v840_v10 = vsel %vm839_vm6, %v828_v2, %v838_v7  ;;  %v869_v12 = vrot.slane %v866_v9, 7 }
 0x1ce   : > { %v842_v13 = vadd.f32 %v840_v10, %v821_v6 }
 0x1cf   : > { %v870_v14 = vsel %vm839_vm6, %v859_v8, %v869_v12 }
 0x1d0   : > { %847 = vst.msk [vmem:[#allocation2] sm:$0x3] %vm845_vm7, %v842_v13  ;;  %v872_v15 = vadd.f32 %v870_v14, %v848_v11 }
 0x1d2   : > { %873 = vst.msk [vmem:[#allocation3] sm:$0x3] %vm845_vm7, %v872_v15 }
 0x1d3 PF: > { %p1367_p9 = scmp.ne.s32.totalorder %s1631_s30, 1 }
 0x1d5   : > { %877 = sbr.rel (%p1367_p9) target bundleno = 671 (0x29f), region = 76 }
 0x1da   : > { %v1480_v16 = vld [vmem:[#allocation6 + $0x38] sm:$0xff]  ;;  %v1479_v18 = vld [vmem:[#allocation6 + $0x30] sm:$0xff]  ;;  %v1478_v1 = vld [vmem:[#allocation6 + $0x28] sm:$0xff] }
 0x1db   : > { %v1488_v17 = vld [vmem:[#allocation6 + $0x78] sm:$0xff]  ;;  %1061 = vmatpush.bf16.msra.mxu0 %v1480_v16  ;;  %v1487_v19 = vld [vmem:[#allocation6 + $0x70] sm:$0xff]  ;;  %v1486_v22 = vld [vmem:[#allocation6 + $0x68] sm:$0xff] }
 0x1dc   : > { %1075 = vmatpush.bf16.msra.mxu1 %v1488_v17  ;;  %v878_v20 = vld [vmem:[#allocation2] sm:$0x3]  ;;  %v880_v21 = vld [vmem:[#allocation3] sm:$0x3]  ;;  %v1477_v27 = vld [vmem:[#allocation6 + $0x20] sm:$0xff] }
 0x1dd   : > { %v879_v23 = vmul.f32 0.125, %v878_v20  ;;  %v881_v24 = vmul.f32 0.125, %v880_v21  ;;  %v1485_v28 = vld [vmem:[#allocation6 + $0x60] sm:$0xff]  ;;  %v1476_v33 = vld [vmem:[#allocation6 + $0x18] sm:$0xff]  ;;  %v1475_v37 = vld [vmem:[#allocation6 + $0x10] sm:$0xff] }
 0x1de   : > { %v1484_v34 = vld [vmem:[#allocation6 + $0x58] sm:$0xff]  ;;  %v1483_v38 = vld [vmem:[#allocation6 + $0x50] sm:$0xff]  ;;  %v1474_v40 = vld [vmem:[#allocation6 + $0x8] sm:$0xff] }
 0x1df   : > { %1062 = vmatpush.bf16.msra.mxu0 %v1479_v18  ;;  %v882_v25 = vmul.f32 %v879_v23, %v879_v23  ;;  %v1482_v41 = vld [vmem:[#allocation6 + $0x48] sm:$0xff]  ;;  %v1473_v44 = vld [vmem:[#allocation6] sm:$0xff]  ;;  %v885_v48 = vld [vmem:[%s1843_s5] sm:$0x3] }
 0x1e0   : > { %1076 = vmatpush.bf16.msra.mxu1 %v1487_v19  ;;  %v1481_v45 = vld [vmem:[#allocation6 + $0x40] sm:$0xff]  ;;  %v898_v52 = vld [vmem:[%s1844_s6] sm:$0x3] }
 0x1e1   : > { %v883_v30 = vsub.f32 %v881_v24, %v882_v25 }
 0x1e3   : > { %1063 = vmatpush.bf16.msra.mxu0 %v1478_v1  ;;  %v884_v31 = vmax.f32 %v883_v30, 0.0 }
 0x1e4   : > { %1077 = vmatpush.bf16.msra.mxu1 %v1486_v22 }
 0x1e5   : > { %v886_v36 = vadd.f32 1e-05, %v884_v31 }
 0x1e7   : > { %1064 = vmatpush.bf16.msra.mxu0 %v1477_v27  ;;  %1543 = vrsqrt.f32 %v886_v36  ;;  %vm893_vm8 = vweird.f32 %v886_v36 }
 0x1e8   : > { %1078 = vmatpush.bf16.msra.mxu1 %v1485_v28 }
 0x1eb   : > { %1065 = vmatpush.bf16.msra.mxu0 %v1476_v33 }
 0x1ec   : > { %1079 = vmatpush.bf16.msra.mxu1 %v1484_v34 }
 0x1ed   : > { %v1544_v39 = vpop.eup %1543 }
 0x1ee   : > { %v888_v42 = vmul.f32 %v1544_v39, %v886_v36  ;;  %vm894_vm9 = vweird.f32 %v1544_v39 }
 0x1ef   : > { %1066 = vmatpush.bf16.msra.mxu0 %v1475_v37  ;;  %vm895_vm10 = vmor %vm893_vm8, %vm894_vm9 }
 0x1f0   : > { %1080 = vmatpush.bf16.msra.mxu1 %v1483_v38  ;;  %v889_v43 = vmul.f32 %v1544_v39, %v888_v42 }
 0x1f2   : > { %v890_v46 = vmul.f32 0.5, %v889_v43 }
 0x1f3   : > { %1067 = vmatpush.bf16.msra.mxu0 %v1474_v40 }
 0x1f4   : > { %1081 = vmatpush.bf16.msra.mxu1 %v1482_v41  ;;  %v891_v47 = vsub.f32 1.5, %v890_v46 }
 0x1f6   : > { %v892_v49 = vmul.f32 %v1544_v39, %v891_v47 }
 0x1f7   : > { %1068 = vmatpush.bf16.msra.mxu0 %v1473_v44 }
 0x1f8   : > { %1082 = vmatpush.bf16.msra.mxu1 %v1481_v45  ;;  %v896_v50 = vsel %vm895_vm10, %v1544_v39, %v892_v49 }
 0x1f9   : > { %v897_v51 = vmul.f32 %v896_v50, %v885_v48 }
 0x1fb   : > { %v899_v53 = vmul.f32 %v897_v51, %v879_v23  ;;  %v902_v54 = vperm.slane %v897_v51, 0  ;;  %v903_v55 = vperm.slane %v897_v51, 1 }
 0x1fd   : > { %v900_v56 = vsub.f32 %v898_v52, %v899_v53  ;;  %v906_v57 = vmul.f32 %v902_v54, %v1790_v26  ;;  %v908_v58 = vmul.f32 %v902_v54, %v1794_v32  ;;  %v907_v59 = vmul.f32 %v903_v55, %v1792_v29  ;;  %v1542_v29 = vld [vmem:[%s1846_s8] ss:$0 sm:$0xff] }
 0x1fe   : > { %v909_v60 = vmul.f32 %v903_v55, %v1796_v35 }
 0x1ff   : > { %v911_v61 = vperm.slane %v900_v56, 0  ;;  %v912_v62 = vperm.slane %v900_v56, 1 }
 0x201   : > { %v915_v63 = vadd.f32 %v911_v61, %v906_v57  ;;  %v917_v0 = vadd.f32 %v911_v61, %v908_v58  ;;  %v916_v2 = vadd.f32 %v912_v62, %v907_v59  ;;  %v918_v3 = vadd.f32 %v912_v62, %v909_v60 }
 0x203   : > { %v919_v4 = vmul.f32 0.2, %v915_v63  ;;  %v921_v5 = vmul.f32 0.2, %v917_v0  ;;  %v920_v6 = vmul.f32 0.2, %v916_v2 }
 0x204   : > { %v922_v7 = vmul.f32 0.2, %v918_v3 }
 0x205   : > { %v923_v8 = vmax.f32 %v915_v63, %v919_v4  ;;  %v925_v9 = vmax.f32 %v917_v0, %v921_v5  ;;  %v924_v10 = vmax.f32 %v916_v2, %v920_v6 }
 0x206   : > { %v926_v26 = vmax.f32 %v918_v3, %v922_v7 }
 0x207   : > { %v927_v11 = vpack.c.bf16 %v925_v9, %v923_v8 }
 0x208   : > { %v928_v32 = vpack.c.bf16 %v926_v26, %v924_v10 }
 0x209   : > { %1069 = vmatmul.bf16.vlgmr.msra.gmra.mxu0 %v927_v11 }
 0x20a   : > { %1083 = vmatmul.bf16.vlgmr.msra.gmra.mxu1 %v928_v32 }
 0x286   : > { %v1070_v35 = vpop.f32.mrf.mxu0 }
 0x287   : > { %v1071_v12 = vadd.f32 %v1542_v29, %v1070_v35  ;;  %v1084_v13 = vpop.f32.mrf.mxu1 }
 0x289   : > { %v1085_v14 = vadd.f32 %v1084_v13, %v1071_v12 }
 0x28b   : > { %1545 = vtanh.f32 %v1085_v14 }
 0x28e   : > { %v1072_v15 = vpop.f32.mrf.mxu0 }
 0x28f   : > { %v1073_v16 = vadd.f32 %v1542_v29, %v1072_v15  ;;  %v1086_v17 = vpop.f32.mrf.mxu1 }
 0x291   : > { %v1546_v18 = vpop.eup %1545  ;;  %v1087_v19 = vadd.f32 %v1086_v17, %v1073_v16 }
 0x292   : > { %v1091_v20 = vmul.f32 0.5, %v1546_v18 }
 0x293   : > { %1547 = vtanh.f32 %v1087_v19 }
 0x294   : > { %v1093_v21 = vadd.f32 0.5, %v1091_v20 }
 0x296   : > { %1095 = vst [vmem:[%s1847_s9] sm:$0xff] %v1093_v21 }
 0x299   : > { %v1548_v1 = vpop.eup %1547 }
 0x29a   : > { %v1092_v22 = vmul.f32 0.5, %v1548_v1 }
 0x29c   : > { %v1094_v23 = vadd.f32 0.5, %v1092_v22 }
 0x29e   : > { %1096 = vst [vmem:[%s1847_s9 + $0x8] sm:$0xff] %v1094_v23 }
 0x29f PF: > { %s21_s11 = sadd.s32 1, %s1639_s11   ;;  %s1850_s30 = smov %s1635_s10 }
 0x2a0   : > { %p18_p10 = scmp.ge.s32.totalorder %s21_s11, 4   ;;  %s1851_s10 = smov %s1853_s13 }
 0x2a2   :  { %20 = sbr.rel (!%p18_p10) target bundleno = 3 (0x3), region = 110 }
 0x2a7   :  { %1122 = vsyncpa [#allocation5], 1 }
 0x2a8   :  { %1124 = vsyncpa [#allocation5 + $0x1], 1 }
 0x2a9   :  { %1125 = vsyncpa [#allocation7], 1 }

</bundles_post_ra>
